<compile_context>
chip_gen: v7x
topology: tpu7x:2x2x1
jax: 0.10.0
libtpu: 0.0.40
codegen_flags: <defaults>
</compile_context>

<pallas_src>
import functools

import jax
import jax.numpy as jnp
from jax.experimental import pallas as pl
from jax.experimental.pallas import tpu as pltpu


def _round_up(x, m):
    return (x + m - 1) // m * m


def _cdiv(a, b):
    return -(-a // b)


# ----------------------------- Pallas kernel ------------------------------ #

def _logmel_kernel(chm_ref, che_ref, cossinT_ref, fbT_ref, out_ref, *,
                   R, TM, nfreq_p):
    # chm_ref: (1, hop_p, TM)   bf16 -- chunks [t*TM, t*TM + TM)
    # che_ref: (1, hop_p, 128)  bf16 -- chunks [t*TM + TM, t*TM + TM + 128)  (overlap)
    allc = jnp.concatenate([chm_ref[0], che_ref[0]], axis=1)      # (hop_p, TM+128)
    # framesT[c*hop_p + d, f] = chunk[f + c, d]  -> R lane-shifted chunk views.
    framesT = jnp.concatenate([allc[:, c:c + TM] for c in range(R)], axis=0)
    # Fused cos|sin windowed DFT, one MXU matmul with f32 accumulation.
    csT = jnp.dot(cossinT_ref[...], framesT,
                  preferred_element_type=jnp.float32)             # (2*nfreq_p, TM)
    re = csT[:nfreq_p, :]                                          # sublane-aligned
    im = csT[nfreq_p:, :]
    powerT = re * re + im * im                                     # (nfreq_p, TM) f32
    melT = jnp.dot(fbT_ref[...], powerT,
                   preferred_element_type=jnp.float32)             # (n_mels, TM) f32
    out_ref[0] = jnp.log1p(melT)


# --------------------------- parameter builders ---------------------------- #

def _hann_window(win_length):
    # torch.hann_window(win_length, periodic=True)
    n = jnp.arange(win_length, dtype=jnp.float32)
    return 0.5 - 0.5 * jnp.cos(2.0 * jnp.pi * n / win_length)


def _dft_matrices(n_fft, win_length):
    # Window padded (centered) to n_fft, folded into the real DFT matrices.
    win = _hann_window(win_length)
    lpad = (n_fft - win_length) // 2
    win = jnp.pad(win, (lpad, n_fft - win_length - lpad))
    n_freqs = n_fft // 2 + 1
    n = jnp.arange(n_fft, dtype=jnp.float32)[:, None]
    k = jnp.arange(n_freqs, dtype=jnp.float32)[None, :]
    ang = 2.0 * jnp.pi * n * k / n_fft
    cos_m = win[:, None] * jnp.cos(ang)
    sin_m = -win[:, None] * jnp.sin(ang)   # sign irrelevant after squaring
    return cos_m.astype(jnp.float32), sin_m.astype(jnp.float32)


def _mel_filterbank(n_freqs, f_min, f_max, n_mels, sample_rate):
    # torchaudio.functional.melscale_fbanks, mel_scale="htk", norm=None
    def hz_to_mel(f):
        return 2595.0 * jnp.log10(1.0 + f / 700.0)

    def mel_to_hz(m):
        return 700.0 * (10.0 ** (m / 2595.0) - 1.0)

    all_freqs = jnp.linspace(0.0, sample_rate / 2.0, n_freqs)
    m_min = hz_to_mel(jnp.float32(f_min))
    m_max = hz_to_mel(jnp.float32(f_max))
    m_pts = jnp.linspace(m_min, m_max, n_mels + 2)
    f_pts = mel_to_hz(m_pts)
    f_diff = f_pts[1:] - f_pts[:-1]                      # (n_mels+1,)
    slopes = f_pts[None, :] - all_freqs[:, None]         # (n_freqs, n_mels+2)
    down = -slopes[:, :-2] / f_diff[:-1]
    up = slopes[:, 2:] / f_diff[1:]
    fb = jnp.maximum(0.0, jnp.minimum(down, up))         # (n_freqs, n_mels)
    return fb.astype(jnp.float32)


# ------------------------------ wrapper ------------------------------------ #

@functools.partial(jax.jit, static_argnames=("sample_rate", "window_ms",
                                             "overlap", "n_mels", "n_fft"))
def log_mel_spectrogram(x, *, sample_rate, window_ms, overlap, n_mels,
                        n_fft=400):
    """Equivalent of LogMelSpectrogram.forward for x of shape (B, T)."""
    x = x.astype(jnp.float32)
    B, T = x.shape
    win_length = window_ms                    # module passes window_ms as win_length
    hop = int(window_ms * overlap)
    n_freqs = n_fft // 2 + 1
    pad = n_fft // 2
    assert T > pad, "reflect padding (center=True) requires T > n_fft // 2"
    assert win_length <= n_fft
    n_frames = 1 + T // hop                   # torch.stft, center=True

    # --- tiling parameters ---
    R = _cdiv(n_fft, hop)                     # hop-chunks spanned by one frame
    hop_p = _round_up(hop, 16)                # chunk height (bf16 sublane packed)
    nfreq_p = _round_up(n_freqs, 128)
    tiles_wanted = 1 if B >= 2 else 2         # keep total grid >= 2 for v7x megacore
    TM = max(128, min(1024, _round_up(_cdiv(n_frames, tiles_wanted), 128)))
    n_ft = _cdiv(n_frames, TM)
    frames_p = n_ft * TM
    n_chunks = frames_p + 128                 # +128: lane-granularity overlap block
    assert R <= 128 and n_chunks * hop >= T + 2 * pad
    # TODO(synk): for very short clips the frames_p/overlap round-up (~(TM+128)*hop
    # zero samples per batch row) dominates; a flattened-rows layout would avoid it.

    # --- glue: reflect pad (center=True), chunk into hops, pad, transpose, bf16 ---
    xp = jnp.pad(x, ((0, 0), (pad, pad)), mode="reflect")
    xp = jnp.pad(xp, ((0, 0), (0, n_chunks * hop - xp.shape[1])))
    ch = jnp.pad(xp.reshape(B, n_chunks, hop).astype(jnp.bfloat16),
                 ((0, 0), (0, 0), (0, hop_p - hop)))
    chunksT = jnp.transpose(ch, (0, 2, 1))                  # (B, hop_p, n_chunks)

    # --- deterministic parameters (windowed DFT in chunked-row order, mel fbank) ---
    cos_m, sin_m = _dft_matrices(n_fft, win_length)          # (n_fft, n_freqs)
    dft = jnp.concatenate(
        [jnp.pad(cos_m, ((0, 0), (0, nfreq_p - n_freqs))),
         jnp.pad(sin_m, ((0, 0), (0, nfreq_p - n_freqs)))],
        axis=1)                                               # (n_fft, 2*nfreq_p)
    k = jnp.arange(n_fft)
    rowpos = (k // hop) * hop_p + (k % hop)                   # k -> chunked row index
    dft_chunked = jnp.zeros((R * hop_p, 2 * nfreq_p), jnp.float32).at[rowpos].set(dft)
    cossinT = jnp.transpose(dft_chunked).astype(jnp.bfloat16)  # (2*nfreq_p, R*hop_p)

    fb = _mel_filterbank(n_freqs, 0.0, sample_rate / 2.0, n_mels,
                         float(sample_rate))                   # (n_freqs, n_mels)
    fbT = jnp.pad(jnp.transpose(fb),
                  ((0, 0), (0, nfreq_p - n_freqs)))            # (n_mels, nfreq_p) f32

    kernel = functools.partial(_logmel_kernel, R=R, TM=TM, nfreq_p=nfreq_p)

    flops = 2 * B * frames_p * (R * hop_p * 2 * nfreq_p + nfreq_p * n_mels)
    bytes_accessed = (chunksT.size * 2 + cossinT.size * 2 + fbT.size * 4
                      + B * n_mels * frames_p * 4)

    out_p = pl.pallas_call(
        kernel,
        out_shape=jax.ShapeDtypeStruct((B, n_mels, frames_p), jnp.float32),
        grid_spec=pltpu.PrefetchScalarGridSpec(
            num_scalar_prefetch=0,
            grid=(B, n_ft),
            in_specs=[
                # main chunk tile: chunks [t*TM, t*TM + TM)
                pl.BlockSpec((1, hop_p, TM), lambda b, t: (b, 0, t)),
                # overlap tile: next 128 chunks (same array, shifted block index)
                pl.BlockSpec((1, hop_p, 128),
                             lambda b, t: (b, 0, (t + 1) * (TM // 128))),
                # constants (constant block index -> fetched once, kept in VMEM)
                pl.BlockSpec((2 * nfreq_p, R * hop_p), lambda b, t: (0, 0)),
                pl.BlockSpec((n_mels, nfreq_p), lambda b, t: (0, 0)),
            ],
            out_specs=pl.BlockSpec((1, n_mels, TM), lambda b, t: (b, 0, t)),
        ),
        compiler_params=pltpu.CompilerParams(
            dimension_semantics=("parallel", "parallel"),
            vmem_limit_bytes=48 * 1024 * 1024),
        cost_estimate=pl.CostEstimate(flops=flops,
                                      transcendentals=B * frames_p * n_mels,
                                      bytes_accessed=bytes_accessed),
    )(chunksT, chunksT, cossinT, fbT)

    # --- glue: drop padded frames; layout is already (B, n_mels, n_frames) ---
    return out_p[:, :, :n_frames]


# ------------------------ pure-JAX f32 reference ---------------------------- #

def _reference(x, *, sample_rate, window_ms, overlap, n_mels, n_fft=400):
    x = x.astype(jnp.float32)
    B, T = x.shape
    hop = int(window_ms * overlap)
    pad = n_fft // 2
    n_freqs = n_fft // 2 + 1
    n_frames = 1 + T // hop
    xp = jnp.pad(x, ((0, 0), (pad, pad)), mode="reflect")
    idx = (jnp.arange(n_frames) * hop)[:, None] + jnp.arange(n_fft)[None, :]
    frames = xp[:, idx]                                       # (B, n_frames, n_fft)
    cos_m, sin_m = _dft_matrices(n_fft, window_ms)
    fb = _mel_filterbank(n_freqs, 0.0, sample_rate / 2.0, n_mels,
                         float(sample_rate))
    hi = jax.lax.Precision.HIGHEST
    re = jnp.einsum("bfn,nk->bfk", frames, cos_m, precision=hi)
    im = jnp.einsum("bfn,nk->bfk", frames, sin_m, precision=hi)
    mel = jnp.einsum("bfk,km->bfm", re * re + im * im, fb, precision=hi)
    return jnp.transpose(jnp.log1p(mel), (0, 2, 1))


# -------------------------------- main ------------------------------------- #

if __name__ == "__main__":
    # Module config (window_ms is used directly as win_length in samples, exactly
    # as the PyTorch module does).  n_fft=400 is the torchaudio default.
    sample_rate = 16000
    window_ms = 400
    overlap = 0.25          # hop = 100
    n_mels = 16

    key = jax.random.PRNGKey(0)
    B, T = 2, 1024
    x = jax.random.normal(key, (B, T), dtype=jnp.float32)

    y = log_mel_spectrogram(x, sample_rate=sample_rate, window_ms=window_ms,
                            overlap=overlap, n_mels=n_mels, n_fft=400)
    y = jax.block_until_ready(y)

    expected_frames = 1 + T // int(window_ms * overlap)
    assert y.shape == (B, n_mels, expected_frames), y.shape
    assert bool(jnp.all(jnp.isfinite(y)))

    # bf16-on-MXU path vs f32 reference (log1p output, generous tolerance).
    y_ref = _reference(x, sample_rate=sample_rate, window_ms=window_ms,
                       overlap=overlap, n_mels=n_mels, n_fft=400)
    assert bool(jnp.allclose(y, y_ref, atol=0.1, rtol=0.05)), \
        float(jnp.max(jnp.abs(y - y_ref)))

    print("KERNEL_OK")
</pallas_src>

<mosaic_0001>
module attributes {stable_mosaic.version = 11 : i64} {
  func.func @_logmel_kernel(%arg0: i32, %arg1: i32, %arg2: memref<1x112x128xbf16, #tpu.memory_space<vmem>>, %arg3: memref<1x112x128xbf16, #tpu.memory_space<vmem>>, %arg4: memref<512x448xbf16, #tpu.memory_space<vmem>>, %arg5: memref<16x256xf32, #tpu.memory_space<vmem>>, %arg6: memref<1x16x128xf32, #tpu.memory_space<vmem>>) attributes {dimension_semantics = [#tpu.dimension_semantics<parallel>, #tpu.dimension_semantics<parallel>], iteration_bounds = array<i64: 2, 1>, scalar_prefetch = 0 : i64, scratch_operands = 0 : i64, tpu.core_type = #tpu.core_type<tc>, window_params = [{transform_indices = @transform_0, window_bounds = array<i64: 1, 112, 128>}, {transform_indices = @transform_1, window_bounds = array<i64: 1, 112, 128>}, {pipeline_mode = #tpu.pipeline_mode<synchronous>, transform_indices = @transform_2, window_bounds = array<i64: 512, 448>}, {pipeline_mode = #tpu.pipeline_mode<synchronous>, transform_indices = @transform_3, window_bounds = array<i64: 16, 256>}, {transform_indices = @transform_4, window_bounds = array<i64: 1, 16, 128>}]} {
    %c0 = arith.constant 0 : index
    %c0_0 = arith.constant 0 : index
    %c0_1 = arith.constant 0 : index
    %0 = vector.load %arg2[%c0, %c0_0, %c0_1] : memref<1x112x128xbf16, #tpu.memory_space<vmem>>, vector<1x112x128xbf16>
    %1 = vector.shape_cast %0 : vector<1x112x128xbf16> to vector<112x128xbf16>
    %c0_2 = arith.constant 0 : index
    %c0_3 = arith.constant 0 : index
    %c0_4 = arith.constant 0 : index
    %2 = vector.load %arg3[%c0_2, %c0_3, %c0_4] : memref<1x112x128xbf16, #tpu.memory_space<vmem>>, vector<1x112x128xbf16>
    %3 = vector.shape_cast %2 : vector<1x112x128xbf16> to vector<112x128xbf16>
    %4 = tpu.concatenate %1, %3 in 1 : vector<112x128xbf16>, vector<112x128xbf16> -> vector<112x256xbf16>
    %5 = vector.extract_strided_slice %4 {offsets = [0, 0], sizes = [112, 128], strides = [1, 1]} : vector<112x256xbf16> to vector<112x128xbf16>
    %6 = vector.extract_strided_slice %4 {offsets = [0, 1], sizes = [112, 128], strides = [1, 1]} : vector<112x256xbf16> to vector<112x128xbf16>
    %7 = vector.extract_strided_slice %4 {offsets = [0, 2], sizes = [112, 128], strides = [1, 1]} : vector<112x256xbf16> to vector<112x128xbf16>
    %8 = vector.extract_strided_slice %4 {offsets = [0, 3], sizes = [112, 128], strides = [1, 1]} : vector<112x256xbf16> to vector<112x128xbf16>
    %9 = tpu.concatenate %5, %6, %7, %8 in 0 : vector<112x128xbf16>, vector<112x128xbf16>, vector<112x128xbf16>, vector<112x128xbf16> -> vector<448x128xbf16>
    %c0_5 = arith.constant 0 : index
    %c0_6 = arith.constant 0 : index
    %10 = vector.load %arg4[%c0_5, %c0_6] : memref<512x448xbf16, #tpu.memory_space<vmem>>, vector<512x448xbf16>
    %cst = arith.constant dense<0.000000e+00> : vector<512x128xf32>
    %11 = tpu.matmul %10, %9, %cst {dimension_numbers = #tpu.dot_dimension_numbers<[1], [0], [0], [1], [0, 0, 1, 1], [], []>} : vector<512x448xbf16>, vector<448x128xbf16>, vector<512x128xf32> -> vector<512x128xf32>
    %12 = vector.extract_strided_slice %11 {offsets = [0, 0], sizes = [256, 128], strides = [1, 1]} : vector<512x128xf32> to vector<256x128xf32>
    %13 = vector.extract_strided_slice %11 {offsets = [256, 0], sizes = [256, 128], strides = [1, 1]} : vector<512x128xf32> to vector<256x128xf32>
    %14 = arith.mulf %12, %12 : vector<256x128xf32>
    %15 = arith.mulf %13, %13 : vector<256x128xf32>
    %16 = arith.addf %14, %15 : vector<256x128xf32>
    %c0_7 = arith.constant 0 : index
    %c0_8 = arith.constant 0 : index
    %17 = vector.load %arg5[%c0_7, %c0_8] : memref<16x256xf32, #tpu.memory_space<vmem>>, vector<16x256xf32>
    %cst_9 = arith.constant dense<0.000000e+00> : vector<16x128xf32>
    %18 = tpu.matmul %17, %16, %cst_9 {dimension_numbers = #tpu.dot_dimension_numbers<[1], [0], [0], [1], [0, 0, 1, 1], [], []>} : vector<16x256xf32>, vector<256x128xf32>, vector<16x128xf32> -> vector<16x128xf32>
    %19 = math.log1p %18 : vector<16x128xf32>
    %c0_10 = arith.constant 0 : index
    %c0_11 = arith.constant 0 : index
    %c0_12 = arith.constant 0 : index
    %20 = vector.load %arg6[%c0_10, %c0_11, %c0_12] : memref<1x16x128xf32, #tpu.memory_space<vmem>>, vector<1x16x128xf32>
    %21 = vector.shape_cast %20 : vector<1x16x128xf32> to vector<16x128xf32>
    %22 = vector.shape_cast %19 : vector<16x128xf32> to vector<1x16x128xf32>
    tpu.vector_store %arg6[%c0_10, %c0_11, %c0_12], %22 {strides = array<i32>} : memref<1x16x128xf32, #tpu.memory_space<vmem>>, vector<1x16x128xf32>,
    return
  }
  func.func @transform_0(%arg0: i32, %arg1: i32) -> (i32, i32, i32) {
    %c0_i32 = arith.constant 0 : i32
    %c0_i32_0 = arith.constant 0 : i32
    return %arg0, %c0_i32, %arg1 : i32, i32, i32
  }
  func.func @transform_1(%arg0: i32, %arg1: i32) -> (i32, i32, i32) {
    %c1_i32 = arith.constant 1 : i32
    %0 = arith.addi %arg1, %c1_i32 : i32
    %c1_i32_0 = arith.constant 1 : i32
    %1 = arith.muli %0, %c1_i32_0 : i32
    %c0_i32 = arith.constant 0 : i32
    %c0_i32_1 = arith.constant 0 : i32
    return %arg0, %c0_i32, %1 : i32, i32, i32
  }
  func.func @transform_2(%arg0: i32, %arg1: i32) -> (i32, i32) {
    %c0_i32 = arith.constant 0 : i32
    %c0_i32_0 = arith.constant 0 : i32
    %c0_i32_1 = arith.constant 0 : i32
    return %c0_i32, %c0_i32_0 : i32, i32
  }
  func.func @transform_3(%arg0: i32, %arg1: i32) -> (i32, i32) {
    %c0_i32 = arith.constant 0 : i32
    %c0_i32_0 = arith.constant 0 : i32
    %c0_i32_1 = arith.constant 0 : i32
    return %c0_i32, %c0_i32_0 : i32, i32
  }
  func.func @transform_4(%arg0: i32, %arg1: i32) -> (i32, i32, i32) {
    %c0_i32 = arith.constant 0 : i32
    %c0_i32_0 = arith.constant 0 : i32
    return %arg0, %c0_i32, %arg1 : i32, i32, i32
  }
}

</mosaic_0001>

<bundles_post_ra>
// kernel: reverse
= control target key start
LH: loop header
LB: loop body
LE: loop exit
PB: predicated region body
PF: predicated region fallthrough
CT: control target
= control target key end

     0   :  { %v2_v0 = vlaneseq  ;;  %s305_s0 = inlined_call_operand.vmem [shape: bf16[2,256], index: 0, kind: input, shape index: {}]   ;;  %s306_s1 = inlined_call_operand.vmem [shape: bf16[2,256], index: 1, kind: output, shape index: {}]  }
   0x2   :  { %v3_v1 = vsub.s32 127, %v2_v0 }
   0x4   :  { %4 = vset.pattern.permute.xlu0 %v3_v1 }
   0x5   :  { %s265_s6 = smov 0   ;;  %s267_s7 = smov 0  }
   0x6   :  { %s269_s8 = smov 0  }
   0x7 LB: > { %s199_s9 = sadd.s32 4294967295, %s252_s8   ;;  %s19_s10 = sadd.s32 1, %s248_s7  ;;  %s252_s8 = sphi %s269_s8, %s10_s8   ;;  %s248_s7 = sphi %s267_s7, %s308_s7   ;;  %s244_s6 = sphi %s265_s6, %s307_s6  }
   0x8   : > { %p20_p0 = scmp.ge.s32.totalorder %s19_s10, 2  ;;  %p201_p1 = scmp.ge.s32.totalorder %s252_s8, 2 }
   0x9   : > { %s38_s11 = sand.u32 (!%p201_p1), 1, %s252_s8   ;;  %s40_s12 = ssub.s32 (!%p201_p1), 1, %s248_s7 }
   0xa   : > { %s310_s10 = smov (%p20_p0, %s19_s10), 0  ;;  %36 = sbr.rel (%p201_p1) target bundleno = 17 (0x11), region = 16 }
   0xb   : > { %s43_s15 = scalar_lea.vmem (!%p201_p1), %s305_s0, %s40_s12  ;;  %s39_s16 = scalar_lea.vmem (!%p201_p1), [#allocation1], %s38_s11 }
   0xc   : > { %v59_v2 = vld [vmem:[%s43_s15] sm:$0x1] (!%p201_p1) }
   0xd   : > { %60 = vst [vmem:[%s39_s16] sm:$0x1] (!%p201_p1), %v59_v2 }
  0x11 PF: > { %p202_p2 = scmp.ge.s32.totalorder %s252_s8, 1  ;;  %p76_p3 = scmp.lt.s32.totalorder %s252_s8, 3 }
  0x13   : > { %p77_p4 = pnand %p202_p2, %p76_p3 }
  0x14   : > { %s86_s17 = sand.u32 (!%p77_p4), 1, %s199_s9   ;;  %v254_v8 = vmov (!%p77_p4), 0.0   ;;  %s125_s22 = scalar_lea.vmem (!%p77_p4), %s306_s1, %s244_s6 }
  0x15   : > { %80 = sbr.rel (%p77_p4) target bundleno = 180 (0xb4), region = 50  ;;  %s87_s18 = scalar_lea.vmem (!%p77_p4), [#allocation1], %s86_s17 }
  0x16   : > { %v103_v3 = vld [vmem:[%s87_s18] sm:$0x1] (!%p77_p4)  ;;  %s90_s19 = scalar_lea.vmem (!%p77_p4), [#allocation3], %s86_s17 }
  0x17   : > { %v104_v4 = vunpack.c.l.bf16 (!%p77_p4), %v103_v3 }
  0x19   : > { %106 = vst [vmem:[#allocation0] sm:$0x3] (!%p77_p4), %v104_v4 }
  0x20   : > { %v108_v5 = vld [vmem:[#allocation0] sm:$0xff] }
  0x21   : > { %109 = vperm.xlu0 %4, %v108_v5  }
  0xa0   : > { %v110_v6 = vpop.permute.xlu0 %109 }
  0xa1   : > { %111 = vst [vmem:[#allocation2] sm:$0xff] %v110_v6 }
  0xa8   : > { %v116_v7 = vld [vmem:[#allocation2] sm:$0x3] }
  0xa9   : > { %v117_v9 = vpack.c.bf16 %v254_v8, %v116_v7 }
  0xab   : > { %119 = vst [vmem:[%s90_s19] sm:$0x1] %v117_v9 }
  0xb2   : > { %v141_v10 = vld [vmem:[%s90_s19] sm:$0x1] }
  0xb3   : > { %142 = vst [vmem:[%s125_s22] sm:$0x1] %v141_v10 }
  0xb4 PF: > { %s10_s8 = sadd.s32 1, %s252_s8   ;;  %s307_s6 = smov %s248_s7 }
  0xb5   : > { %p7_p5 = scmp.ge.s32.totalorder %s10_s8, 4   ;;  %s308_s7 = smov %s310_s10 }
  0xb7   :  { %9 = sbr.rel (!%p7_p5) target bundleno = 7 (0x7), region = 110 }

</bundles_post_ra>
